<compile_context>
chip_gen: v7x
topology: tpu7x:2x2x1
jax: 0.10.0
libtpu: 0.0.40
codegen_flags: <defaults>
</compile_context>

<pallas_src>
import functools

import jax
import jax.numpy as jnp
from jax import lax
from jax.experimental import pallas as pl
from jax.experimental.pallas import tpu as pltpu


def _cnn_kernel(x_ref, w_ref, b_ref, o_ref, *, K, l_out, tb, batch_first):
    # x_ref: (C8, L_pad*tb) f32   compact block, column index = pos*tb + word
    # w_ref: (F, K*C8)      bf16  w_ref[f, k*C8 + c] = weight[f, c, k]
    # b_ref: (F, 1)         f32
    # o_ref: (tb, F) if batch_first else (F, tb)
    w = w_ref[...]
    m = None
    for l in range(l_out):
        # In-VMEM im2col for output position l: K lane-tile-aligned slices of
        # the compact block concatenated along sublanes (C8 % 8 == 0), then a
        # single fused-contraction MXU matmul.  bf16 cast done here (VPU).
        u = jnp.concatenate(
            [x_ref[:, (l + k) * tb:(l + k + 1) * tb] for k in range(K)],
            axis=0,
        ).astype(jnp.bfloat16)                                  # (K*C8, tb)
        y = jnp.dot(w, u, preferred_element_type=jnp.float32)   # (F, tb) f32
        m = y if m is None else jnp.maximum(m, y)                # streamed max

    # bias + ReLU hoisted outside the length reduction (exact).
    out = jnp.maximum(m + b_ref[...], 0.0)                      # (F, tb) f32
    if batch_first:
        o_ref[...] = out.T.astype(o_ref.dtype)                  # XLU transpose
    else:
        o_ref[...] = out.astype(o_ref.dtype)


def _pick_tb(B, C8, L_pad, F, K, *, tb_max=1024, vmem_budget=20 * 1024 * 1024):
    """Lane-dense batch tile: multiple of 128, >= 2 grid steps when the batch
    allows it (v7x megacore + pipeline overlap), clamped so the per-step VMEM
    footprint stays inside every generation's budget (v5e 16 MiB scoped
    default .. v7x 64 MiB physical)."""
    b128 = max(128, pl.cdiv(B, 128) * 128)
    tb = min(tb_max, b128)
    if b128 >= 256:
        tb = min(tb, (b128 // 2) // 128 * 128)
    tb = max(128, tb // 128 * 128)

    def est(t):
        return (2 * C8 * L_pad * t * 4        # double-buffered f32 input block
                + 2 * F * t * 4               # double-buffered output block
                + K * C8 * t * 6              # live im2col operand (f32 + bf16)
                + 4 * F * t * 4               # y / running max / epilogue
                + 4 * F * K * C8 * 2)         # weights + bias buffers

    while tb > 128 and est(tb) > vmem_budget:
        tb -= 128
    return tb


def cnn_forward(x, weight, bias, padding, *, tb=None):
    """x: (B, C, L) f32, weight: (F, C, K) [PyTorch Conv1d layout], bias: (F,)."""
    B, C, L = x.shape
    F, _, K = weight.shape
    L_pad = L + 2 * padding
    l_out = L_pad - K + 1
    assert l_out >= 1, "kernel_size too large for padded word length"

    C8 = pl.cdiv(C, 8) * 8                    # sublane-align channels (zero pad)
    if tb is None:
        tb = _pick_tb(B, C8, L_pad, F, K)
    B_pad = pl.cdiv(B, tb) * tb
    nblk = B_pad // tb
    batch_first = (F % 128 == 0)              # lane-dense (tb, F) output blocks

    # --- wrapper glue: pad + lay batch on lanes (compact; no im2col) ---------
    x_pad = jnp.pad(x, ((0, B_pad - B), (0, C8 - C), (padding, padding)))
    # x2d[c, blk*L_pad*tb + p*tb + word] = x_pad[blk*tb + word, c, p]
    x2d = jnp.transpose(x_pad.reshape(nblk, tb, C8, L_pad), (2, 0, 3, 1))
    x2d = x2d.reshape(C8, nblk * L_pad * tb)  # stays f32; cast in-kernel

    w_p = jnp.pad(weight, ((0, 0), (0, C8 - C), (0, 0)))          # (F, C8, K)
    w2d = jnp.transpose(w_p, (0, 2, 1)).reshape(F, K * C8).astype(jnp.bfloat16)
    b2d = bias.reshape(F, 1).astype(jnp.float32)

    if batch_first:
        out_shape = jax.ShapeDtypeStruct((B_pad, F), x.dtype)
        out_spec = pl.BlockSpec((tb, F), lambda i: (i, 0))
    else:
        out_shape = jax.ShapeDtypeStruct((F, B_pad), x.dtype)
        out_spec = pl.BlockSpec((F, tb), lambda i: (0, i))

    out = pl.pallas_call(
        functools.partial(_cnn_kernel, K=K, l_out=l_out, tb=tb,
                          batch_first=batch_first),
        out_shape=out_shape,
        grid_spec=pltpu.PrefetchScalarGridSpec(
            num_scalar_prefetch=0,
            grid=(nblk,),
            in_specs=[
                pl.BlockSpec((C8, L_pad * tb), lambda i: (0, i)),
                pl.BlockSpec((F, K * C8), lambda i: (0, 0)),
                pl.BlockSpec((F, 1), lambda i: (0, 0)),
            ],
            out_specs=out_spec,
        ),
        compiler_params=pltpu.CompilerParams(
            dimension_semantics=("parallel",),
            vmem_limit_bytes=32 * 1024 * 1024),
    )(x2d, w2d, b2d)

    if batch_first:
        return out[:B]                        # already (B, F); no HBM transpose
    return out[:, :B].T                       # (F, B_pad) -> (B, F)


def _reference(x, weight, bias, padding):
    # Pure-JAX reference (Conv1d + bias + relu + max over length) with the same
    # bf16 quantization of x / weight that the kernel's MXU path applies.
    xb = x.astype(jnp.bfloat16).astype(jnp.float32)
    wb = weight.astype(jnp.bfloat16).astype(jnp.float32)
    conv = lax.conv_general_dilated(
        xb, wb, window_strides=(1,), padding=[(padding, padding)],
        dimension_numbers=("NCH", "OIH", "NCH"))
    conv = conv + bias[None, :, None]
    return jnp.max(jnp.maximum(conv, 0.0), axis=-1)


def _run_case(key, batch, embed_size, num_filter, kernel_size, padding,
              max_word_length):
    kx, kw, kb = jax.random.split(key, 3)
    x = jax.random.normal(kx, (batch, embed_size, max_word_length), jnp.float32)
    # PyTorch Conv1d default init: U(-bound, bound), bound = 1/sqrt(C*K).
    bound = 1.0 / (embed_size * kernel_size) ** 0.5
    weight = jax.random.uniform(kw, (num_filter, embed_size, kernel_size),
                                jnp.float32, -bound, bound)
    bias = jax.random.uniform(kb, (num_filter,), jnp.float32, -bound, bound)

    out = jax.block_until_ready(cnn_forward(x, weight, bias, padding))
    ref = _reference(x, weight, bias, padding)
    assert out.shape == (batch, num_filter), out.shape
    assert jnp.allclose(out, ref, atol=2e-3, rtol=2e-3), \
        float(jnp.max(jnp.abs(out - ref)))


if __name__ == "__main__":
    key = jax.random.PRNGKey(0)
    # Module hyperparameters: CNN(embed_size, num_filter, kernel_size, padding)
    # Case 1: a5 toy config -> lane-dense (F, tb) output path (F < 128).
    _run_case(jax.random.fold_in(key, 1), batch=2, embed_size=8, num_filter=16,
              kernel_size=5, padding=1, max_word_length=12)
    # Case 2: F % 128 == 0 -> batch-first (tb, F) output path, multiple grid
    # blocks (nblk >= 2), non-multiple-of-8 channel count (zero-padded).
    _run_case(jax.random.fold_in(key, 2), batch=300, embed_size=6,
              num_filter=128, kernel_size=3, padding=2, max_word_length=16)
    print("KERNEL_OK")
</pallas_src>

<mosaic_0001>
module attributes {stable_mosaic.version = 11 : i64} {
  func.func @_cnn_kernel(%arg0: i32, %arg1: memref<8x1792xf32, #tpu.memory_space<vmem>>, %arg2: memref<16x40xbf16, #tpu.memory_space<vmem>>, %arg3: memref<16x1xf32, #tpu.memory_space<vmem>>, %arg4: memref<16x128xf32, #tpu.memory_space<vmem>>) attributes {dimension_semantics = [#tpu.dimension_semantics<parallel>], iteration_bounds = array<i64: 1>, scalar_prefetch = 0 : i64, scratch_operands = 0 : i64, tpu.core_type = #tpu.core_type<tc>, window_params = [{transform_indices = @transform_0, window_bounds = array<i64: 8, 1792>}, {pipeline_mode = #tpu.pipeline_mode<synchronous>, transform_indices = @transform_1, window_bounds = array<i64: 16, 40>}, {pipeline_mode = #tpu.pipeline_mode<synchronous>, transform_indices = @transform_2, window_bounds = array<i64: 16, 1>}, {transform_indices = @transform_3, window_bounds = array<i64: 16, 128>}]} {
    %c0 = arith.constant 0 : index
    %c0_0 = arith.constant 0 : index
    %0 = vector.load %arg2[%c0, %c0_0] : memref<16x40xbf16, #tpu.memory_space<vmem>>, vector<16x40xbf16>
    %c0_1 = arith.constant 0 : index
    %c0_2 = arith.constant 0 : index
    %1 = vector.load %arg1[%c0_1, %c0_2] : memref<8x1792xf32, #tpu.memory_space<vmem>>, vector<8x128xf32>
    %c0_3 = arith.constant 0 : index
    %c128 = arith.constant 128 : index
    %2 = vector.load %arg1[%c0_3, %c128] : memref<8x1792xf32, #tpu.memory_space<vmem>>, vector<8x128xf32>
    %c0_4 = arith.constant 0 : index
    %c256 = arith.constant 256 : index
    %3 = vector.load %arg1[%c0_4, %c256] : memref<8x1792xf32, #tpu.memory_space<vmem>>, vector<8x128xf32>
    %c0_5 = arith.constant 0 : index
    %c384 = arith.constant 384 : index
    %4 = vector.load %arg1[%c0_5, %c384] : memref<8x1792xf32, #tpu.memory_space<vmem>>, vector<8x128xf32>
    %c0_6 = arith.constant 0 : index
    %c512 = arith.constant 512 : index
    %5 = vector.load %arg1[%c0_6, %c512] : memref<8x1792xf32, #tpu.memory_space<vmem>>, vector<8x128xf32>
    %6 = tpu.concatenate %1, %2, %3, %4, %5 in 0 : vector<8x128xf32>, vector<8x128xf32>, vector<8x128xf32>, vector<8x128xf32>, vector<8x128xf32> -> vector<40x128xf32>
    %7 = arith.truncf %6 : vector<40x128xf32> to vector<40x128xbf16>
    %cst = arith.constant dense<0.000000e+00> : vector<16x128xf32>
    %8 = tpu.matmul %0, %7, %cst {dimension_numbers = #tpu.dot_dimension_numbers<[1], [0], [0], [1], [0, 0, 1, 1], [], []>} : vector<16x40xbf16>, vector<40x128xbf16>, vector<16x128xf32> -> vector<16x128xf32>
    %c0_7 = arith.constant 0 : index
    %c128_8 = arith.constant 128 : index
    %9 = vector.load %arg1[%c0_7, %c128_8] : memref<8x1792xf32, #tpu.memory_space<vmem>>, vector<8x128xf32>
    %c0_9 = arith.constant 0 : index
    %c256_10 = arith.constant 256 : index
    %10 = vector.load %arg1[%c0_9, %c256_10] : memref<8x1792xf32, #tpu.memory_space<vmem>>, vector<8x128xf32>
    %c0_11 = arith.constant 0 : index
    %c384_12 = arith.constant 384 : index
    %11 = vector.load %arg1[%c0_11, %c384_12] : memref<8x1792xf32, #tpu.memory_space<vmem>>, vector<8x128xf32>
    %c0_13 = arith.constant 0 : index
    %c512_14 = arith.constant 512 : index
    %12 = vector.load %arg1[%c0_13, %c512_14] : memref<8x1792xf32, #tpu.memory_space<vmem>>, vector<8x128xf32>
    %c0_15 = arith.constant 0 : index
    %c640 = arith.constant 640 : index
    %13 = vector.load %arg1[%c0_15, %c640] : memref<8x1792xf32, #tpu.memory_space<vmem>>, vector<8x128xf32>
    %14 = tpu.concatenate %9, %10, %11, %12, %13 in 0 : vector<8x128xf32>, vector<8x128xf32>, vector<8x128xf32>, vector<8x128xf32>, vector<8x128xf32> -> vector<40x128xf32>
    %15 = arith.truncf %14 : vector<40x128xf32> to vector<40x128xbf16>
    %cst_16 = arith.constant dense<0.000000e+00> : vector<16x128xf32>
    %16 = tpu.matmul %0, %15, %cst_16 {dimension_numbers = #tpu.dot_dimension_numbers<[1], [0], [0], [1], [0, 0, 1, 1], [], []>} : vector<16x40xbf16>, vector<40x128xbf16>, vector<16x128xf32> -> vector<16x128xf32>
    %17 = arith.maximumf %8, %16 : vector<16x128xf32>
    %c0_17 = arith.constant 0 : index
    %c256_18 = arith.constant 256 : index
    %18 = vector.load %arg1[%c0_17, %c256_18] : memref<8x1792xf32, #tpu.memory_space<vmem>>, vector<8x128xf32>
    %c0_19 = arith.constant 0 : index
    %c384_20 = arith.constant 384 : index
    %19 = vector.load %arg1[%c0_19, %c384_20] : memref<8x1792xf32, #tpu.memory_space<vmem>>, vector<8x128xf32>
    %c0_21 = arith.constant 0 : index
    %c512_22 = arith.constant 512 : index
    %20 = vector.load %arg1[%c0_21, %c512_22] : memref<8x1792xf32, #tpu.memory_space<vmem>>, vector<8x128xf32>
    %c0_23 = arith.constant 0 : index
    %c640_24 = arith.constant 640 : index
    %21 = vector.load %arg1[%c0_23, %c640_24] : memref<8x1792xf32, #tpu.memory_space<vmem>>, vector<8x128xf32>
    %c0_25 = arith.constant 0 : index
    %c768 = arith.constant 768 : index
    %22 = vector.load %arg1[%c0_25, %c768] : memref<8x1792xf32, #tpu.memory_space<vmem>>, vector<8x128xf32>
    %23 = tpu.concatenate %18, %19, %20, %21, %22 in 0 : vector<8x128xf32>, vector<8x128xf32>, vector<8x128xf32>, vector<8x128xf32>, vector<8x128xf32> -> vector<40x128xf32>
    %24 = arith.truncf %23 : vector<40x128xf32> to vector<40x128xbf16>
    %cst_26 = arith.constant dense<0.000000e+00> : vector<16x128xf32>
    %25 = tpu.matmul %0, %24, %cst_26 {dimension_numbers = #tpu.dot_dimension_numbers<[1], [0], [0], [1], [0, 0, 1, 1], [], []>} : vector<16x40xbf16>, vector<40x128xbf16>, vector<16x128xf32> -> vector<16x128xf32>
    %26 = arith.maximumf %17, %25 : vector<16x128xf32>
    %c0_27 = arith.constant 0 : index
    %c384_28 = arith.constant 384 : index
    %27 = vector.load %arg1[%c0_27, %c384_28] : memref<8x1792xf32, #tpu.memory_space<vmem>>, vector<8x128xf32>
    %c0_29 = arith.constant 0 : index
    %c512_30 = arith.constant 512 : index
    %28 = vector.load %arg1[%c0_29, %c512_30] : memref<8x1792xf32, #tpu.memory_space<vmem>>, vector<8x128xf32>
    %c0_31 = arith.constant 0 : index
    %c640_32 = arith.constant 640 : index
    %29 = vector.load %arg1[%c0_31, %c640_32] : memref<8x1792xf32, #tpu.memory_space<vmem>>, vector<8x128xf32>
    %c0_33 = arith.constant 0 : index
    %c768_34 = arith.constant 768 : index
    %30 = vector.load %arg1[%c0_33, %c768_34] : memref<8x1792xf32, #tpu.memory_space<vmem>>, vector<8x128xf32>
    %c0_35 = arith.constant 0 : index
    %c896 = arith.constant 896 : index
    %31 = vector.load %arg1[%c0_35, %c896] : memref<8x1792xf32, #tpu.memory_space<vmem>>, vector<8x128xf32>
    %32 = tpu.concatenate %27, %28, %29, %30, %31 in 0 : vector<8x128xf32>, vector<8x128xf32>, vector<8x128xf32>, vector<8x128xf32>, vector<8x128xf32> -> vector<40x128xf32>
    %33 = arith.truncf %32 : vector<40x128xf32> to vector<40x128xbf16>
    %cst_36 = arith.constant dense<0.000000e+00> : vector<16x128xf32>
    %34 = tpu.matmul %0, %33, %cst_36 {dimension_numbers = #tpu.dot_dimension_numbers<[1], [0], [0], [1], [0, 0, 1, 1], [], []>} : vector<16x40xbf16>, vector<40x128xbf16>, vector<16x128xf32> -> vector<16x128xf32>
    %35 = arith.maximumf %26, %34 : vector<16x128xf32>
    %c0_37 = arith.constant 0 : index
    %c512_38 = arith.constant 512 : index
    %36 = vector.load %arg1[%c0_37, %c512_38] : memref<8x1792xf32, #tpu.memory_space<vmem>>, vector<8x128xf32>
    %c0_39 = arith.constant 0 : index
    %c640_40 = arith.constant 640 : index
    %37 = vector.load %arg1[%c0_39, %c640_40] : memref<8x1792xf32, #tpu.memory_space<vmem>>, vector<8x128xf32>
    %c0_41 = arith.constant 0 : index
    %c768_42 = arith.constant 768 : index
    %38 = vector.load %arg1[%c0_41, %c768_42] : memref<8x1792xf32, #tpu.memory_space<vmem>>, vector<8x128xf32>
    %c0_43 = arith.constant 0 : index
    %c896_44 = arith.constant 896 : index
    %39 = vector.load %arg1[%c0_43, %c896_44] : memref<8x1792xf32, #tpu.memory_space<vmem>>, vector<8x128xf32>
    %c0_45 = arith.constant 0 : index
    %c1024 = arith.constant 1024 : index
    %40 = vector.load %arg1[%c0_45, %c1024] : memref<8x1792xf32, #tpu.memory_space<vmem>>, vector<8x128xf32>
    %41 = tpu.concatenate %36, %37, %38, %39, %40 in 0 : vector<8x128xf32>, vector<8x128xf32>, vector<8x128xf32>, vector<8x128xf32>, vector<8x128xf32> -> vector<40x128xf32>
    %42 = arith.truncf %41 : vector<40x128xf32> to vector<40x128xbf16>
    %cst_46 = arith.constant dense<0.000000e+00> : vector<16x128xf32>
    %43 = tpu.matmul %0, %42, %cst_46 {dimension_numbers = #tpu.dot_dimension_numbers<[1], [0], [0], [1], [0, 0, 1, 1], [], []>} : vector<16x40xbf16>, vector<40x128xbf16>, vector<16x128xf32> -> vector<16x128xf32>
    %44 = arith.maximumf %35, %43 : vector<16x128xf32>
    %c0_47 = arith.constant 0 : index
    %c640_48 = arith.constant 640 : index
    %45 = vector.load %arg1[%c0_47, %c640_48] : memref<8x1792xf32, #tpu.memory_space<vmem>>, vector<8x128xf32>
    %c0_49 = arith.constant 0 : index
    %c768_50 = arith.constant 768 : index
    %46 = vector.load %arg1[%c0_49, %c768_50] : memref<8x1792xf32, #tpu.memory_space<vmem>>, vector<8x128xf32>
    %c0_51 = arith.constant 0 : index
    %c896_52 = arith.constant 896 : index
    %47 = vector.load %arg1[%c0_51, %c896_52] : memref<8x1792xf32, #tpu.memory_space<vmem>>, vector<8x128xf32>
    %c0_53 = arith.constant 0 : index
    %c1024_54 = arith.constant 1024 : index
    %48 = vector.load %arg1[%c0_53, %c1024_54] : memref<8x1792xf32, #tpu.memory_space<vmem>>, vector<8x128xf32>
    %c0_55 = arith.constant 0 : index
    %c1152 = arith.constant 1152 : index
    %49 = vector.load %arg1[%c0_55, %c1152] : memref<8x1792xf32, #tpu.memory_space<vmem>>, vector<8x128xf32>
    %50 = tpu.concatenate %45, %46, %47, %48, %49 in 0 : vector<8x128xf32>, vector<8x128xf32>, vector<8x128xf32>, vector<8x128xf32>, vector<8x128xf32> -> vector<40x128xf32>
    %51 = arith.truncf %50 : vector<40x128xf32> to vector<40x128xbf16>
    %cst_56 = arith.constant dense<0.000000e+00> : vector<16x128xf32>
    %52 = tpu.matmul %0, %51, %cst_56 {dimension_numbers = #tpu.dot_dimension_numbers<[1], [0], [0], [1], [0, 0, 1, 1], [], []>} : vector<16x40xbf16>, vector<40x128xbf16>, vector<16x128xf32> -> vector<16x128xf32>
    %53 = arith.maximumf %44, %52 : vector<16x128xf32>
    %c0_57 = arith.constant 0 : index
    %c768_58 = arith.constant 768 : index
    %54 = vector.load %arg1[%c0_57, %c768_58] : memref<8x1792xf32, #tpu.memory_space<vmem>>, vector<8x128xf32>
    %c0_59 = arith.constant 0 : index
    %c896_60 = arith.constant 896 : index
    %55 = vector.load %arg1[%c0_59, %c896_60] : memref<8x1792xf32, #tpu.memory_space<vmem>>, vector<8x128xf32>
    %c0_61 = arith.constant 0 : index
    %c1024_62 = arith.constant 1024 : index
    %56 = vector.load %arg1[%c0_61, %c1024_62] : memref<8x1792xf32, #tpu.memory_space<vmem>>, vector<8x128xf32>
    %c0_63 = arith.constant 0 : index
    %c1152_64 = arith.constant 1152 : index
    %57 = vector.load %arg1[%c0_63, %c1152_64] : memref<8x1792xf32, #tpu.memory_space<vmem>>, vector<8x128xf32>
    %c0_65 = arith.constant 0 : index
    %c1280 = arith.constant 1280 : index
    %58 = vector.load %arg1[%c0_65, %c1280] : memref<8x1792xf32, #tpu.memory_space<vmem>>, vector<8x128xf32>
    %59 = tpu.concatenate %54, %55, %56, %57, %58 in 0 : vector<8x128xf32>, vector<8x128xf32>, vector<8x128xf32>, vector<8x128xf32>, vector<8x128xf32> -> vector<40x128xf32>
    %60 = arith.truncf %59 : vector<40x128xf32> to vector<40x128xbf16>
    %cst_66 = arith.constant dense<0.000000e+00> : vector<16x128xf32>
    %61 = tpu.matmul %0, %60, %cst_66 {dimension_numbers = #tpu.dot_dimension_numbers<[1], [0], [0], [1], [0, 0, 1, 1], [], []>} : vector<16x40xbf16>, vector<40x128xbf16>, vector<16x128xf32> -> vector<16x128xf32>
    %62 = arith.maximumf %53, %61 : vector<16x128xf32>
    %c0_67 = arith.constant 0 : index
    %c896_68 = arith.constant 896 : index
    %63 = vector.load %arg1[%c0_67, %c896_68] : memref<8x1792xf32, #tpu.memory_space<vmem>>, vector<8x128xf32>
    %c0_69 = arith.constant 0 : index
    %c1024_70 = arith.constant 1024 : index
    %64 = vector.load %arg1[%c0_69, %c1024_70] : memref<8x1792xf32, #tpu.memory_space<vmem>>, vector<8x128xf32>
    %c0_71 = arith.constant 0 : index
    %c1152_72 = arith.constant 1152 : index
    %65 = vector.load %arg1[%c0_71, %c1152_72] : memref<8x1792xf32, #tpu.memory_space<vmem>>, vector<8x128xf32>
    %c0_73 = arith.constant 0 : index
    %c1280_74 = arith.constant 1280 : index
    %66 = vector.load %arg1[%c0_73, %c1280_74] : memref<8x1792xf32, #tpu.memory_space<vmem>>, vector<8x128xf32>
    %c0_75 = arith.constant 0 : index
    %c1408 = arith.constant 1408 : index
    %67 = vector.load %arg1[%c0_75, %c1408] : memref<8x1792xf32, #tpu.memory_space<vmem>>, vector<8x128xf32>
    %68 = tpu.concatenate %63, %64, %65, %66, %67 in 0 : vector<8x128xf32>, vector<8x128xf32>, vector<8x128xf32>, vector<8x128xf32>, vector<8x128xf32> -> vector<40x128xf32>
    %69 = arith.truncf %68 : vector<40x128xf32> to vector<40x128xbf16>
    %cst_76 = arith.constant dense<0.000000e+00> : vector<16x128xf32>
    %70 = tpu.matmul %0, %69, %cst_76 {dimension_numbers = #tpu.dot_dimension_numbers<[1], [0], [0], [1], [0, 0, 1, 1], [], []>} : vector<16x40xbf16>, vector<40x128xbf16>, vector<16x128xf32> -> vector<16x128xf32>
    %71 = arith.maximumf %62, %70 : vector<16x128xf32>
    %c0_77 = arith.constant 0 : index
    %c1024_78 = arith.constant 1024 : index
    %72 = vector.load %arg1[%c0_77, %c1024_78] : memref<8x1792xf32, #tpu.memory_space<vmem>>, vector<8x128xf32>
    %c0_79 = arith.constant 0 : index
    %c1152_80 = arith.constant 1152 : index
    %73 = vector.load %arg1[%c0_79, %c1152_80] : memref<8x1792xf32, #tpu.memory_space<vmem>>, vector<8x128xf32>
    %c0_81 = arith.constant 0 : index
    %c1280_82 = arith.constant 1280 : index
    %74 = vector.load %arg1[%c0_81, %c1280_82] : memref<8x1792xf32, #tpu.memory_space<vmem>>, vector<8x128xf32>
    %c0_83 = arith.constant 0 : index
    %c1408_84 = arith.constant 1408 : index
    %75 = vector.load %arg1[%c0_83, %c1408_84] : memref<8x1792xf32, #tpu.memory_space<vmem>>, vector<8x128xf32>
    %c0_85 = arith.constant 0 : index
    %c1536 = arith.constant 1536 : index
    %76 = vector.load %arg1[%c0_85, %c1536] : memref<8x1792xf32, #tpu.memory_space<vmem>>, vector<8x128xf32>
    %77 = tpu.concatenate %72, %73, %74, %75, %76 in 0 : vector<8x128xf32>, vector<8x128xf32>, vector<8x128xf32>, vector<8x128xf32>, vector<8x128xf32> -> vector<40x128xf32>
    %78 = arith.truncf %77 : vector<40x128xf32> to vector<40x128xbf16>
    %cst_86 = arith.constant dense<0.000000e+00> : vector<16x128xf32>
    %79 = tpu.matmul %0, %78, %cst_86 {dimension_numbers = #tpu.dot_dimension_numbers<[1], [0], [0], [1], [0, 0, 1, 1], [], []>} : vector<16x40xbf16>, vector<40x128xbf16>, vector<16x128xf32> -> vector<16x128xf32>
    %80 = arith.maximumf %71, %79 : vector<16x128xf32>
    %c0_87 = arith.constant 0 : index
    %c1152_88 = arith.constant 1152 : index
    %81 = vector.load %arg1[%c0_87, %c1152_88] : memref<8x1792xf32, #tpu.memory_space<vmem>>, vector<8x128xf32>
    %c0_89 = arith.constant 0 : index
    %c1280_90 = arith.constant 1280 : index
    %82 = vector.load %arg1[%c0_89, %c1280_90] : memref<8x1792xf32, #tpu.memory_space<vmem>>, vector<8x128xf32>
    %c0_91 = arith.constant 0 : index
    %c1408_92 = arith.constant 1408 : index
    %83 = vector.load %arg1[%c0_91, %c1408_92] : memref<8x1792xf32, #tpu.memory_space<vmem>>, vector<8x128xf32>
    %c0_93 = arith.constant 0 : index
    %c1536_94 = arith.constant 1536 : index
    %84 = vector.load %arg1[%c0_93, %c1536_94] : memref<8x1792xf32, #tpu.memory_space<vmem>>, vector<8x128xf32>
    %c0_95 = arith.constant 0 : index
    %c1664 = arith.constant 1664 : index
    %85 = vector.load %arg1[%c0_95, %c1664] : memref<8x1792xf32, #tpu.memory_space<vmem>>, vector<8x128xf32>
    %86 = tpu.concatenate %81, %82, %83, %84, %85 in 0 : vector<8x128xf32>, vector<8x128xf32>, vector<8x128xf32>, vector<8x128xf32>, vector<8x128xf32> -> vector<40x128xf32>
    %87 = arith.truncf %86 : vector<40x128xf32> to vector<40x128xbf16>
    %cst_96 = arith.constant dense<0.000000e+00> : vector<16x128xf32>
    %88 = tpu.matmul %0, %87, %cst_96 {dimension_numbers = #tpu.dot_dimension_numbers<[1], [0], [0], [1], [0, 0, 1, 1], [], []>} : vector<16x40xbf16>, vector<40x128xbf16>, vector<16x128xf32> -> vector<16x128xf32>
    %89 = arith.maximumf %80, %88 : vector<16x128xf32>
    %c0_97 = arith.constant 0 : index
    %c0_98 = arith.constant 0 : index
    %90 = vector.load %arg3[%c0_97, %c0_98] : memref<16x1xf32, #tpu.memory_space<vmem>>, vector<16x1xf32>
    %91 = vector.broadcast %90 : vector<16x1xf32> to vector<16x128xf32>
    %92 = arith.addf %89, %91 : vector<16x128xf32>
    %cst_99 = arith.constant 0.000000e+00 : f32
    %93 = vector.broadcast %cst_99 : f32 to vector<16x128xf32>
    %94 = arith.maximumf %92, %93 : vector<16x128xf32>
    %c0_100 = arith.constant 0 : index
    %c0_101 = arith.constant 0 : index
    %95 = vector.load %arg4[%c0_100, %c0_101] : memref<16x128xf32, #tpu.memory_space<vmem>>, vector<16x128xf32>
    tpu.vector_store %arg4[%c0_100, %c0_101], %94 {strides = array<i32>} : memref<16x128xf32, #tpu.memory_space<vmem>>, vector<16x128xf32>,
    return
  }
  func.func @transform_0(%arg0: i32) -> (i32, i32) {
    %c0_i32 = arith.constant 0 : i32
    %c0_i32_0 = arith.constant 0 : i32
    return %c0_i32, %arg0 : i32, i32
  }
  func.func @transform_1(%arg0: i32) -> (i32, i32) {
    %c0_i32 = arith.constant 0 : i32
    %c0_i32_0 = arith.constant 0 : i32
    %c0_i32_1 = arith.constant 0 : i32
    return %c0_i32, %c0_i32_0 : i32, i32
  }
  func.func @transform_2(%arg0: i32) -> (i32, i32) {
    %c0_i32 = arith.constant 0 : i32
    %c0_i32_0 = arith.constant 0 : i32
    %c0_i32_1 = arith.constant 0 : i32
    return %c0_i32, %c0_i32_0 : i32, i32
  }
  func.func @transform_3(%arg0: i32) -> (i32, i32) {
    %c0_i32 = arith.constant 0 : i32
    %c0_i32_0 = arith.constant 0 : i32
    return %c0_i32, %arg0 : i32, i32
  }
}

</mosaic_0001>

<bundles_post_ra>
// kernel: tpu_custom_call.1
= control target key start
LH: loop header
LB: loop body
LE: loop exit
PB: predicated region body
PF: predicated region fallthrough
CT: control target
= control target key end

     0   :  { %8 = vsyncpa [#allocation3], 0  ;;  %s919_s0 = inlined_call_operand.hbm [shape: f32[8,1792], index: 0, kind: input, shape index: {}]   ;;  %s920_s1 = inlined_call_operand.vmem [shape: bf16[16,40], index: 1, kind: input, shape index: {}]   ;;  %s921_s2 = inlined_call_operand.vmem [shape: f32[16,1], index: 2, kind: input, shape index: {}]   ;;  %s922_s3 = inlined_call_operand.hbm [shape: f32[16,128], index: 3, kind: output, shape index: {}]  }
   0x1   :  { %9 = vsyncpa [#allocation4], 0  ;;  %s777_s12 = smov [#allocation2]   ;;  %s729_s16 = scalar_lea.hbm %s919_s0, 1792 }
   0x2   :  { %s16_s13 = sshll.u32 %s777_s12, 4  ;;  %p730_p0 = scmp.ne.s32.totalorder %s919_s0, %s729_s16  ;;  %s17_s13 = int_to_ptr.vmem [resolvable:$true] %s16_s13 }
   0x3   :  { %p733_p1 = scmp.lt.u32.totalorder %s729_s16, %s919_s0 }
   0x5   :  { %p735_p2 = pnand %p733_p1, %p730_p0 }
   0x7   :  { %738 = shalt.err (!%p735_p2)
}
   0x8   :  { %s739_s21 = scalar_lea.vmem %s17_s13, 1792  ;;  %p744_p4 = scmp.lt.s32.totalorder %s17_s13, %s17_s13 }
   0x9   :  { %p740_p3 = scmp.ne.s32.totalorder %s17_s13, %s739_s21  ;;  %p745_p5 = scmp.lt.s32.totalorder %s739_s21, %s739_s21 }
   0xb   :  { %p746_p6 = por %p745_p5, %p744_p4 }
   0xd   :  { %p747_p7 = pnand %p746_p6, %p740_p3 }
   0xf   :  { %750 = shalt.err (!%p747_p7)
}
  0x10   :  { %19 = dma.hbm_to_vmem [thread:$0]  %s919_s0, 1792, %s17_s13, [#allocation3]  }
  0x11   :  { %773 = dma.done.wait [#allocation3], 1792  }
  0x12   :  { %774 = vsyncadd [#allocation3], 4294965504  ;;  %v778_v0 = vmov 0.0   ;;  %vm779_vm0 = vmmov 0   ;;  %v780_v1 = vmov 0   ;;  %v30_v2 = vld [vmem:[#allocation2] sm:$0xff] }
  0x13   :  { %620 = vmatprep.subr.bf16.mxu0 %v778_v0  ;;  %630 = vmatprep.subr.bf16.mxu1 %v778_v0  ;;  %v31_v3 = vld [vmem:[#allocation2 + $0x8] sm:$0xff]  ;;  %v32_v4 = vld [vmem:[#allocation2 + $0x10] sm:$0xff]  ;;  %v33_v6 = vld [vmem:[#allocation2 + $0x18] sm:$0xff]  ;;  %vm47_vm1 = vcmask 1043456   ;;  %vm43_vm2 = vcmask 326656  }
  0x14   :  { %626 = vmatprep.mubr.msk.bf16.mxu0 %vm779_vm0, %v778_v0  ;;  %636 = vmatprep.mubr.msk.bf16.mxu1 %vm779_vm0, %v778_v0  ;;  %v35_v5 = vpack.c.bf16 %v31_v3, %v30_v2  ;;  %v93_v7 = vpack.c.bf16 %v32_v4, %v31_v3  ;;  %v34_v8 = vld [vmem:[#allocation2 + $0x20] sm:$0xff]  ;;  %v92_v9 = vld [vmem:[#allocation2 + $0x28] sm:$0xff]  ;;  %v36_v10 = vpack.c.bf16 %v33_v6, %v32_v4  ;;  %v142_v19 = vld [vmem:[#allocation2 + $0x30] sm:$0xff] }
  0x15   :  { %727 = vset.pattern.permute.xlu0 %v780_v1  ;;  %v94_v11 = vpack.c.bf16 %v34_v8, %v33_v6  ;;  %v37_v12 = vpack.c.bf16 %v34_v8, %v34_v8  ;;  %v95_v13 = vpack.c.bf16 %v92_v9, %v92_v9  ;;  %v534_v14 = vld [vmem:[%s921_s2] sm:$0xff]  ;;  %v535_v15 = vld [vmem:[%s921_s2 + $0x8] sm:$0xff]  ;;  %v191_v20 = vld [vmem:[#allocation2 + $0x38] sm:$0xff]  ;;  %v143_v21 = vpack.c.bf16 %v92_v9, %v34_v8 }
  0x16   :  { %621 = vmatpush3.bf16.msra.mxu0 %v35_v5  ;;  %631 = vmatpush3.bf16.msra.mxu1 %v93_v7  ;;  %v837_v18 = vld [vmem:[%s920_s1] sm:$0xff]   ;;  %v192_v22 = vpack.c.bf16 %v142_v19, %v92_v9  ;;  %v144_v23 = vpack.c.bf16 %v142_v19, %v142_v19  ;;  %v193_v24 = vpack.c.bf16 %v191_v20, %v191_v20  ;;  %v289_v28 = vld [vmem:[#allocation2 + $0x48] sm:$0xff]  ;;  %v338_v35 = vld [vmem:[#allocation2 + $0x50] sm:$0xff]  ;;  %s781_s1 = smov [#allocation5]  }
  0x17   :  { %622 = vmatprep.subr.bf16.mxu0 %v778_v0  ;;  %632 = vmatprep.subr.bf16.mxu1 %v778_v0  ;;  %v49_v16 = vsel %vm47_vm1, %v37_v12, 0  ;;  %v97_v17 = vsel %vm47_vm1, %v95_v13, 0  ;;  %v240_v27 = vld [vmem:[#allocation2 + $0x40] sm:$0xff]  ;;  %v241_v29 = vpack.c.bf16 %v191_v20, %v142_v19  ;;  %v291_v32 = vpack.c.bf16 %v289_v28, %v289_v28  ;;  %v387_v36 = vld [vmem:[#allocation2 + $0x58] sm:$0xff]  ;;  %v485_v44 = vld [vmem:[#allocation2 + $0x68] sm:$0xff]  ;;  %s557_s2 = sshll.u32 %s781_s1, 4  ;;  %s558_s2 = int_to_ptr.vmem [resolvable:$true] %s557_s2 }
  0x18   :  { %538 = vperm.xlu0 %727, %v534_v14   ;;  %v146_v25 = vsel %vm47_vm1, %v144_v23, 0  ;;  %v195_v26 = vsel %vm47_vm1, %v193_v24, 0  ;;  %v290_v30 = vpack.c.bf16 %v240_v27, %v191_v20  ;;  %v242_v31 = vpack.c.bf16 %v240_v27, %v240_v27  ;;  %v436_v43 = vld [vmem:[#allocation2 + $0x60] sm:$0xff]  ;;  %s751_s29 = scalar_lea.vmem %s558_s2, 256  ;;  %p756_p9 = scmp.lt.s32.totalorder %s558_s2, %s558_s2 }
  0x19   :  { %v293_v34 = vsel %vm47_vm1, %v291_v32, 0  ;;  %v339_v37 = vpack.c.bf16 %v289_v28, %v240_v27  ;;  %v388_v38 = vpack.c.bf16 %v338_v35, %v289_v28  ;;  %v340_v39 = vpack.c.bf16 %v338_v35, %v338_v35  ;;  %p752_p8 = scmp.ne.s32.totalorder %s558_s2, %s751_s29  ;;  %p757_p10 = scmp.lt.s32.totalorder %s751_s29, %s751_s29 }
  0x1a   :  { %623 = vmatpush3.bf16.msra.mxu0 %v36_v10  ;;  %633 = vmatpush3.bf16.msra.mxu1 %v94_v11  ;;  %v244_v33 = vsel %vm47_vm1, %v242_v31, 0  ;;  %v389_v40 = vpack.c.bf16 %v387_v36, %v387_v36  ;;  %v437_v45 = vpack.c.bf16 %v387_v36, %v338_v35  ;;  %v486_v46 = vpack.c.bf16 %v436_v43, %v387_v36 }
  0x1b   :  { %624 = vmatprep.subr.bf16.mxu0 %v778_v0  ;;  %634 = vmatprep.subr.bf16.mxu1 %v778_v0  ;;  %v342_v41 = vsel %vm47_vm1, %v340_v39, 0  ;;  %v438_v47 = vpack.c.bf16 %v436_v43, %v436_v43  ;;  %v487_v48 = vpack.c.bf16 %v485_v44, %v485_v44  ;;  %p758_p11 = por %p757_p10, %p756_p9 }
  0x1c   :  { %543 = vperm.xlu0 %727, %v535_v15   ;;  %v391_v42 = vsel %vm47_vm1, %v389_v40, 0 }
  0x1d   :  { %v440_v49 = vsel %vm47_vm1, %v438_v47, 0  ;;  %v489_v50 = vsel %vm47_vm1, %v487_v48, 0  ;;  %p759_p12 = pnand %p758_p11, %p752_p8 }
  0x1e   :  { %625 = vmatpush3.bf16.msra.mxu0 %v49_v16  ;;  %635 = vmatpush3.bf16.msra.mxu1 %v97_v17 }
  0x1f   :  { %640 = vmatprep.subr.bf16.mxu0 %v778_v0  ;;  %650 = vmatprep.subr.bf16.mxu1 %v778_v0 }
  0x21   :  { %627 = vmatmul.mubr.msk.bf16.vlgmr.msra.gmra.mrb[0].mxu0 %vm43_vm2, %v837_v18  ;;  %637 = vmatmul.mubr.msk.bf16.vlgmr.msra.gmra.mrb[0].mxu1 %vm43_vm2, %v837_v18 }
  0x22   :  { %641 = vmatpush3.bf16.msra.mxu0 %v36_v10  ;;  %651 = vmatpush3.bf16.msra.mxu1 %v94_v11 }
  0x23   :  { %642 = vmatprep.subr.bf16.mxu0 %v778_v0  ;;  %652 = vmatprep.subr.bf16.mxu1 %v778_v0 }
  0x24   :  { %646 = vmatprep.mubr.msk.bf16.mxu0 %vm779_vm0, %v778_v0  ;;  %656 = vmatprep.mubr.msk.bf16.mxu1 %vm779_vm0, %v778_v0 }
  0x26   :  { %643 = vmatpush3.bf16.msra.mxu0 %v143_v21  ;;  %653 = vmatpush3.bf16.msra.mxu1 %v192_v22 }
  0x27   :  { %644 = vmatprep.subr.bf16.mxu0 %v778_v0  ;;  %654 = vmatprep.subr.bf16.mxu1 %v778_v0 }
  0x2a   :  { %645 = vmatpush3.bf16.msra.mxu0 %v146_v25  ;;  %655 = vmatpush3.bf16.msra.mxu1 %v195_v26 }
  0x2b   :  { %660 = vmatprep.subr.bf16.mxu0 %v778_v0  ;;  %670 = vmatprep.subr.bf16.mxu1 %v778_v0 }
  0x2d   :  { %647 = vmatmul.mubr.msk.bf16.vlgmr.msra.gmra.mrb[4].mxu0 %vm43_vm2, %v837_v18  ;;  %657 = vmatmul.mubr.msk.bf16.vlgmr.msra.gmra.mrb[4].mxu1 %vm43_vm2, %v837_v18 }
  0x2e   :  { %661 = vmatpush3.bf16.msra.mxu0 %v143_v21  ;;  %671 = vmatpush3.bf16.msra.mxu1 %v192_v22 }
  0x2f   :  { %662 = vmatprep.subr.bf16.mxu0 %v778_v0  ;;  %672 = vmatprep.subr.bf16.mxu1 %v778_v0 }
  0x30   :  { %666 = vmatprep.mubr.msk.bf16.mxu0 %vm779_vm0, %v778_v0  ;;  %676 = vmatprep.mubr.msk.bf16.mxu1 %vm779_vm0, %v778_v0 }
  0x32   :  { %663 = vmatpush3.bf16.msra.mxu0 %v241_v29  ;;  %673 = vmatpush3.bf16.msra.mxu1 %v290_v30 }
  0x33   :  { %664 = vmatprep.subr.bf16.mxu0 %v778_v0  ;;  %674 = vmatprep.subr.bf16.mxu1 %v778_v0 }
  0x36   :  { %665 = vmatpush3.bf16.msra.mxu0 %v244_v33  ;;  %675 = vmatpush3.bf16.msra.mxu1 %v293_v34 }
  0x37   :  { %680 = vmatprep.subr.bf16.mxu0 %v778_v0  ;;  %690 = vmatprep.subr.bf16.mxu1 %v778_v0 }
  0x39   :  { %667 = vmatmul.mubr.msk.bf16.vlgmr.msra.gmra.mrb[8].mxu0 %vm43_vm2, %v837_v18  ;;  %677 = vmatmul.mubr.msk.bf16.vlgmr.msra.gmra.mrb[8].mxu1 %vm43_vm2, %v837_v18 }
  0x3a   :  { %681 = vmatpush3.bf16.msra.mxu0 %v241_v29  ;;  %691 = vmatpush3.bf16.msra.mxu1 %v290_v30 }
  0x3b   :  { %682 = vmatprep.subr.bf16.mxu0 %v778_v0  ;;  %692 = vmatprep.subr.bf16.mxu1 %v778_v0 }
  0x3c   :  { %686 = vmatprep.mubr.msk.bf16.mxu0 %vm779_vm0, %v778_v0  ;;  %696 = vmatprep.mubr.msk.bf16.mxu1 %vm779_vm0, %v778_v0 }
  0x3e   :  { %683 = vmatpush3.bf16.msra.mxu0 %v339_v37  ;;  %693 = vmatpush3.bf16.msra.mxu1 %v388_v38 }
  0x3f   :  { %684 = vmatprep.subr.bf16.mxu0 %v778_v0  ;;  %694 = vmatprep.subr.bf16.mxu1 %v778_v0 }
  0x42   :  { %685 = vmatpush3.bf16.msra.mxu0 %v342_v41  ;;  %695 = vmatpush3.bf16.msra.mxu1 %v391_v42 }
  0x43   :  { %700 = vmatprep.subr.bf16.mxu0 %v778_v0  ;;  %710 = vmatprep.subr.bf16.mxu1 %v778_v0 }
  0x45   :  { %687 = vmatmul.mubr.msk.bf16.vlgmr.msra.gmra.mrb[12].mxu0 %vm43_vm2, %v837_v18  ;;  %697 = vmatmul.mubr.msk.bf16.vlgmr.msra.gmra.mrb[12].mxu1 %vm43_vm2, %v837_v18 }
  0x46   :  { %701 = vmatpush3.bf16.msra.mxu0 %v339_v37  ;;  %711 = vmatpush3.bf16.msra.mxu1 %v388_v38 }
  0x47   :  { %702 = vmatprep.subr.bf16.mxu0 %v778_v0  ;;  %712 = vmatprep.subr.bf16.mxu1 %v778_v0 }
  0x48   :  { %706 = vmatprep.mubr.msk.bf16.mxu0 %vm779_vm0, %v778_v0  ;;  %716 = vmatprep.mubr.msk.bf16.mxu1 %vm779_vm0, %v778_v0 }
  0x4a   :  { %703 = vmatpush3.bf16.msra.mxu0 %v437_v45  ;;  %713 = vmatpush3.bf16.msra.mxu1 %v486_v46 }
  0x4b   :  { %704 = vmatprep.subr.bf16.mxu0 %v778_v0  ;;  %714 = vmatprep.subr.bf16.mxu1 %v778_v0 }
  0x4e   :  { %705 = vmatpush3.bf16.msra.mxu0 %v440_v49  ;;  %715 = vmatpush3.bf16.msra.mxu1 %v489_v50 }
  0x51   :  { %707 = vmatmul.mubr.msk.bf16.vlgmr.msra.gmra.mrb[16].mxu0 %vm43_vm2, %v837_v18  ;;  %717 = vmatmul.mubr.msk.bf16.vlgmr.msra.gmra.mrb[16].mxu1 %vm43_vm2, %v837_v18 }
  0x97   :  { %v539_v33 = vpop.permute.xlu0 %538 }
  0x9b   :  { %v544_v47 = vpop.permute.xlu0 %543 }
  0xf4   :  { %v85_v51 = vpop.f32.mrb[0].mxu0  ;;  %v133_v52 = vpop.f32.mrb[0].mxu1 }
  0xf5   :  { %v140_v53 = vmax.f32 %v85_v51, %v133_v52  ;;  %v628_v54 = vpop.f32.mrb[1].mxu0  ;;  %v638_v55 = vpop.f32.mrb[1].mxu1 }
  0xf6   :  { %v88_v56 = vpop.f32.mrb[2].mxu0  ;;  %v136_v57 = vpop.f32.mrb[2].mxu1 }
  0xf7   :  { %v141_v58 = vmax.f32 %v88_v56, %v136_v57  ;;  %v629_v59 = vpop.f32.mrb[3].mxu0  ;;  %v639_v60 = vpop.f32.mrb[3].mxu1 }
 0x100   :  { %v182_v61 = vpop.f32.mrb[4].mxu0  ;;  %v231_v62 = vpop.f32.mrb[4].mxu1 }
 0x101   :  { %v189_v63 = vmax.f32 %v140_v53, %v182_v61  ;;  %v648_v0 = vpop.f32.mrb[5].mxu0  ;;  %v658_v1 = vpop.f32.mrb[5].mxu1 }
 0x102   :  { %v185_v2 = vpop.f32.mrb[6].mxu0  ;;  %v234_v3 = vpop.f32.mrb[6].mxu1 }
 0x103   :  { %v238_v4 = vmax.f32 %v189_v63, %v231_v62  ;;  %v190_v5 = vmax.f32 %v141_v58, %v185_v2  ;;  %v649_v6 = vpop.f32.mrb[7].mxu0  ;;  %v659_v7 = vpop.f32.mrb[7].mxu1 }
 0x105   :  { %v239_v8 = vmax.f32 %v190_v5, %v234_v3 }
 0x10c   :  { %v280_v9 = vpop.f32.mrb[8].mxu0  ;;  %v329_v10 = vpop.f32.mrb[8].mxu1 }
 0x10d   :  { %v287_v11 = vmax.f32 %v238_v4, %v280_v9  ;;  %v668_v12 = vpop.f32.mrb[9].mxu0  ;;  %v678_v13 = vpop.f32.mrb[9].mxu1 }
 0x10e   :  { %v283_v14 = vpop.f32.mrb[10].mxu0  ;;  %v332_v15 = vpop.f32.mrb[10].mxu1 }
 0x10f   :  { %v336_v16 = vmax.f32 %v287_v11, %v329_v10  ;;  %v288_v17 = vmax.f32 %v239_v8, %v283_v14  ;;  %v669_v18 = vpop.f32.mrb[11].mxu0  ;;  %v679_v19 = vpop.f32.mrb[11].mxu1 }
 0x111   :  { %v337_v20 = vmax.f32 %v288_v17, %v332_v15 }
 0x118   :  { %v378_v21 = vpop.f32.mrb[12].mxu0  ;;  %v427_v22 = vpop.f32.mrb[12].mxu1 }
 0x119   :  { %v385_v23 = vmax.f32 %v336_v16, %v378_v21  ;;  %v688_v24 = vpop.f32.mrb[13].mxu0  ;;  %v698_v25 = vpop.f32.mrb[13].mxu1 }
 0x11a   :  { %v381_v26 = vpop.f32.mrb[14].mxu0  ;;  %v430_v27 = vpop.f32.mrb[14].mxu1 }
 0x11b   :  { %v434_v28 = vmax.f32 %v385_v23, %v427_v22  ;;  %v386_v29 = vmax.f32 %v337_v20, %v381_v26  ;;  %v689_v30 = vpop.f32.mrb[15].mxu0  ;;  %v699_v31 = vpop.f32.mrb[15].mxu1 }
 0x11d   :  { %v435_v32 = vmax.f32 %v386_v29, %v430_v27 }
 0x124   :  { %v476_v34 = vpop.f32.mrb[16].mxu0  ;;  %v525_v35 = vpop.f32.mrb[16].mxu1 }
 0x125   :  { %v483_v36 = vmax.f32 %v434_v28, %v476_v34  ;;  %v708_v37 = vpop.f32.mrb[17].mxu0  ;;  %v718_v38 = vpop.f32.mrb[17].mxu1 }
 0x126   :  { %v479_v39 = vpop.f32.mrb[18].mxu0  ;;  %v528_v40 = vpop.f32.mrb[18].mxu1 }
 0x127   :  { %v532_v41 = vmax.f32 %v483_v36, %v525_v35  ;;  %v484_v42 = vmax.f32 %v435_v32, %v479_v39  ;;  %v709_v43 = vpop.f32.mrb[19].mxu0  ;;  %v719_v44 = vpop.f32.mrb[19].mxu1 }
 0x129   :  { %v546_v45 = vadd.f32 %v539_v33, %v532_v41  ;;  %v533_v46 = vmax.f32 %v484_v42, %v528_v40 }
 0x12b   :  { %v548_v48 = vmax.f32 %v546_v45, 0.0  ;;  %v547_v49 = vadd.f32 %v544_v47, %v533_v46 }
 0x12d   :  { %550 = vst [vmem:[#allocation5] sm:$0xff] %v548_v48  ;;  %v549_v50 = vmax.f32 %v547_v49, 0.0 }
 0x12f   :  { %551 = vst [vmem:[#allocation5 + $0x8] sm:$0xff] %v549_v50 }
 0x130   :  { %762 = shalt.err (!%p759_p12)
}
 0x131   :  { %s763_s5 = scalar_lea.hbm %s922_s3, 256 }
 0x132   :  { %p764_p13 = scmp.ne.s32.totalorder %s922_s3, %s763_s5  ;;  %p767_p0 = scmp.lt.u32.totalorder %s763_s5, %s922_s3 }
 0x134   :  { %p769_p1 = pnand %p767_p0, %p764_p13 }
 0x136   :  { %772 = shalt.err (!%p769_p1)
}
 0x137   :  { %s782_s10 = smov 128   ;;  %s783_s11 = smov 8  }
 0x138   :  { %563 = dma.vmem_to_hbm [thread:$0]  %s558_s2, 256, %s922_s3, [#allocation4], %s782_s10, %s782_s10, %s783_s11  }
 0x139   :  { %775 = dma.done.wait [#allocation4], 256  }
 0x13a   :  { %776 = vsyncadd [#allocation4], 4294967040 }
 0x13b   :  { %567 = vsyncpa [#allocation3], 1 }
 0x13c   :  { %568 = vsyncpa [#allocation4], 1 }

</bundles_post_ra>
